<compile_context>
chip_gen: v7x
topology: tpu7x:2x2x1
jax: 0.10.0
libtpu: 0.0.40
codegen_flags: <defaults>
</compile_context>

<pallas_src>
import math

import jax
import jax.numpy as jnp
from jax.experimental import pallas as pl
from jax.experimental.pallas import tpu as pltpu

_MIB = 1024 * 1024
_WEIGHT_RESIDENT_BUDGET = 20 * _MIB   # cap on the 2x-buffered resident weight
_TOTAL_VMEM_BUDGET = 36 * _MIB        # conservative tile footprint (fits v7x)


def _cdiv(a: int, b: int) -> int:
    return -(-a // b)


def _round_up(a: int, b: int) -> int:
    return _cdiv(a, b) * b


def _pick_tile(dim: int, cap: int) -> int:
    """Tile for an N/K dim: a 128-multiple dividing `dim`, or the full dim."""
    if dim % 128 != 0 or dim <= cap:
        return dim                      # full dim is always a legal block size
    for t in (cap - cap % 128, 512, 256, 128):
        if 0 < t <= cap and dim % t == 0:
            return t
    return dim


# ----------------------------- kernels ------------------------------------ #

def _linear_bias_kernel(x_ref, w_ref, b_ref, o_ref):
    # Single K step: no accumulator scratch, write the result directly.
    acc = jnp.dot(x_ref[...], w_ref[...], preferred_element_type=jnp.float32)
    o_ref[...] = (acc + b_ref[...]).astype(o_ref.dtype)


def _linear_bias_acc_kernel(x_ref, w_ref, b_ref, o_ref, acc_ref):
    k = pl.program_id(2)

    @pl.when(k == 0)
    def _():
        acc_ref[...] = jnp.zeros_like(acc_ref)

    acc_ref[...] += jnp.dot(x_ref[...], w_ref[...],
                            preferred_element_type=jnp.float32)

    @pl.when(k == pl.num_programs(2) - 1)
    def _():
        o_ref[...] = (acc_ref[...] + b_ref[...]).astype(o_ref.dtype)


# --------------------------- parameter setup ------------------------------ #

def make_params(weight, bias, *, compute_dtype=jnp.bfloat16):
    """One-time parameter prep (NOT per forward call).

    weight: (heads*d_k, d_model)  -- PyTorch nn.Linear layout
    bias:   (heads*d_k,) or None
    returns (weight_t, bias2d): (d_model, n_out) in compute_dtype, (1, n_out) f32
    """
    n_out, d_model = weight.shape
    weight_t = jnp.asarray(weight.T, dtype=compute_dtype)
    if bias is None:
        bias = jnp.zeros((n_out,), jnp.float32)
    bias2d = jnp.asarray(bias, dtype=jnp.float32).reshape(1, n_out)
    return weight_t, bias2d


# ------------------------------ forward ------------------------------------ #

def prepare_for_mha(x, weight_t, bias2d, heads: int, d_k: int, *,
                    out_dtype=None,
                    tm_cap: int = 1024, tn_cap: int = 512, tk_cap: int = 512,
                    weight_resident_bytes: int = _WEIGHT_RESIDENT_BUDGET):
    """Equivalent of PrepareForMultiHeadAttention.forward.

    x:        (..., d_model)
    weight_t: (d_model, heads*d_k)  from make_params (pre-transposed, cast)
    bias2d:   (1, heads*d_k) float32
    returns   (..., heads, 1, d_k)
    """
    head_shape = x.shape[:-1]
    d_model = x.shape[-1]
    n_out = heads * d_k
    assert weight_t.shape == (d_model, n_out), weight_t.shape
    assert bias2d.shape == (1, n_out), bias2d.shape

    compute_dtype = weight_t.dtype
    out_dtype = x.dtype if out_dtype is None else out_dtype
    cd_bytes = jnp.dtype(compute_dtype).itemsize
    out_bytes = jnp.dtype(out_dtype).itemsize
    m_align = 8 if cd_bytes >= 4 else (16 if cd_bytes == 2 else 32)

    m = int(math.prod(head_shape)) if head_shape else 1
    x2d = x.reshape(m, d_model).astype(compute_dtype)

    # ---- N / K tiles: keep the weight VMEM-resident when it fits ----------
    if 2 * d_model * n_out * cd_bytes <= weight_resident_bytes:
        tk, tn = d_model, n_out
    else:
        tk = _pick_tile(d_model, tk_cap)
        tn = _pick_tile(n_out, tn_cap)
    grid_k = d_model // tk
    grid_n = n_out // tn

    # ---- M tile: balanced blocks, minimal padding -------------------------
    grid_m = max(1, _cdiv(m, tm_cap))
    tm = _round_up(_cdiv(m, grid_m), m_align)

    # Guarantee >= 2 parallel blocks so both v7x TensorCores get work.
    if grid_m * grid_n == 1 and m > m_align:
        grid_m = 2
        tm = _round_up(_cdiv(m, grid_m), m_align)

    def footprint(tm_):
        f = 2 * (tm_ * tk + tk * tn) * cd_bytes      # double-buffered inputs
        f += 2 * tm_ * tn * out_bytes                # double-buffered output
        f += 2 * tn * 4                              # bias (f32)
        if grid_k > 1:
            f += tm_ * tn * 4                        # f32 accumulator scratch
        return f

    while footprint(tm) > _TOTAL_VMEM_BUDGET and tm > m_align:
        tm = max(m_align, _round_up(tm // 2, m_align))

    grid_m = _cdiv(m, tm)
    m_pad = grid_m * tm

    # Only the (small) M remainder of the activation is ever padded.
    if m_pad != m:
        x2d = jnp.pad(x2d, ((0, m_pad - m), (0, 0)))

    grid = (grid_m, grid_n, grid_k)
    vmem_limit = int(min(100 * _MIB, max(32 * _MIB, footprint(tm) + 8 * _MIB)))

    cost = pl.CostEstimate(
        flops=2 * m * n_out * d_model,
        transcendentals=0,
        bytes_accessed=int(m * d_model * cd_bytes
                           + d_model * n_out * cd_bytes
                           + m * n_out * out_bytes),
    )

    if grid_k > 1:
        kernel = _linear_bias_acc_kernel
        scratch = [pltpu.VMEM((tm, tn), jnp.float32)]
    else:
        kernel = _linear_bias_kernel
        scratch = []

    y2d = pl.pallas_call(
        kernel,
        out_shape=jax.ShapeDtypeStruct((m_pad, n_out), out_dtype),
        grid_spec=pltpu.PrefetchScalarGridSpec(
            num_scalar_prefetch=0,
            grid=grid,
            in_specs=[
                pl.BlockSpec((tm, tk), lambda i, j, k: (i, k)),
                pl.BlockSpec((tk, tn), lambda i, j, k: (k, j)),
                pl.BlockSpec((1, tn), lambda i, j, k: (0, j)),
            ],
            out_specs=pl.BlockSpec((tm, tn), lambda i, j, k: (i, j)),
            scratch_shapes=scratch,
        ),
        compiler_params=pltpu.CompilerParams(
            dimension_semantics=("parallel", "parallel", "arbitrary"),
            vmem_limit_bytes=vmem_limit,
        ),
        cost_estimate=cost,
    )(x2d, weight_t, bias2d)

    if m_pad != m:
        y2d = y2d[:m]
    # x.view(*head_shape, heads, -1, d_k): the -1 resolves to 1 here.
    return y2d.reshape(*head_shape, heads, 1, d_k)


# ----------------------------- reference ----------------------------------- #

def _ref_forward(x, weight_t, bias2d, heads, d_k, out_dtype):
    """f32 reference on the (possibly dtype-rounded) parameters."""
    head_shape = x.shape[:-1]
    d_model = x.shape[-1]
    xf = x.astype(weight_t.dtype).astype(jnp.float32).reshape(-1, d_model)
    wf = weight_t.astype(jnp.float32)
    y = xf @ wf + bias2d.astype(jnp.float32)
    return y.reshape(*head_shape, heads, 1, d_k).astype(out_dtype)


if __name__ == "__main__":
    key = jax.random.PRNGKey(0)

    # ---- Case 1: small, module-consistent shapes, f32 compute -------------
    seq, batch, d_model = 8, 2, 32
    heads, d_k = 4, 16
    n_out = heads * d_k

    kx, kw, kb, key = jax.random.split(key, 4)
    x = jax.random.normal(kx, (seq, batch, d_model), dtype=jnp.float32)
    bound = 1.0 / math.sqrt(d_model)
    weight = jax.random.uniform(kw, (n_out, d_model), jnp.float32, -bound, bound)
    bias = jax.random.uniform(kb, (n_out,), jnp.float32, -bound, bound)

    w_t_f32, b2d = make_params(weight, bias, compute_dtype=jnp.float32)
    out = jax.block_until_ready(prepare_for_mha(x, w_t_f32, b2d, heads, d_k))
    ref = _ref_forward(x, w_t_f32, b2d, heads, d_k, x.dtype)
    assert out.shape == (seq, batch, heads, 1, d_k), out.shape
    assert jnp.allclose(out, ref, atol=1e-4, rtol=1e-4)

    # ---- Case 2: larger shapes, default bf16 compute, weight-resident -----
    seq2, batch2, d_model2 = 128, 8, 256
    heads2, d_k2 = 8, 64
    n_out2 = heads2 * d_k2

    kx2, kw2, kb2, key = jax.random.split(key, 4)
    x2 = jax.random.normal(kx2, (seq2, batch2, d_model2), dtype=jnp.float32)
    bound2 = 1.0 / math.sqrt(d_model2)
    weight2 = jax.random.uniform(kw2, (n_out2, d_model2), jnp.float32,
                                 -bound2, bound2)
    bias2 = jax.random.uniform(kb2, (n_out2,), jnp.float32, -bound2, bound2)

    w2_t_bf16, b2d2 = make_params(weight2, bias2, compute_dtype=jnp.bfloat16)
    out2 = jax.block_until_ready(
        prepare_for_mha(x2, w2_t_bf16, b2d2, heads2, d_k2))
    ref2 = _ref_forward(x2, w2_t_bf16, b2d2, heads2, d_k2, x2.dtype)
    assert out2.shape == (seq2, batch2, heads2, 1, d_k2), out2.shape
    assert jnp.allclose(out2, ref2, atol=2e-3, rtol=2e-3)

    # ---- Case 3: force multi-step K / N grids (accumulator path) ----------
    out3 = jax.block_until_ready(
        prepare_for_mha(x2, w2_t_bf16, b2d2, heads2, d_k2,
                        weight_resident_bytes=0, tk_cap=128, tn_cap=256))
    assert out3.shape == (seq2, batch2, heads2, 1, d_k2), out3.shape
    assert jnp.allclose(out3, ref2, atol=2e-3, rtol=2e-3)

    print("KERNEL_OK")
</pallas_src>

<mosaic_0001>
module attributes {stable_mosaic.version = 11 : i64} {
  func.func @_linear_bias_kernel(%arg0: i32, %arg1: i32, %arg2: i32, %arg3: memref<8x32xf32, #tpu.memory_space<vmem>>, %arg4: memref<32x64xf32, #tpu.memory_space<vmem>>, %arg5: memref<1x64xf32, #tpu.memory_space<vmem>>, %arg6: memref<8x64xf32, #tpu.memory_space<vmem>>) attributes {dimension_semantics = [#tpu.dimension_semantics<parallel>, #tpu.dimension_semantics<parallel>, #tpu.dimension_semantics<arbitrary>], iteration_bounds = array<i64: 2, 1, 1>, scalar_prefetch = 0 : i64, scratch_operands = 0 : i64, tpu.core_type = #tpu.core_type<tc>, window_params = [{transform_indices = @transform_0, window_bounds = array<i64: 8, 32>}, {transform_indices = @transform_1, window_bounds = array<i64: 32, 64>}, {transform_indices = @transform_2, window_bounds = array<i64: 1, 64>}, {transform_indices = @transform_3, window_bounds = array<i64: 8, 64>}]} {
    %c0 = arith.constant 0 : index
    %c0_0 = arith.constant 0 : index
    %0 = vector.load %arg3[%c0, %c0_0] : memref<8x32xf32, #tpu.memory_space<vmem>>, vector<8x32xf32>
    %c0_1 = arith.constant 0 : index
    %c0_2 = arith.constant 0 : index
    %1 = vector.load %arg4[%c0_1, %c0_2] : memref<32x64xf32, #tpu.memory_space<vmem>>, vector<32x64xf32>
    %cst = arith.constant dense<0.000000e+00> : vector<8x64xf32>
    %2 = tpu.matmul %0, %1, %cst {dimension_numbers = #tpu.dot_dimension_numbers<[1], [0], [0], [1], [0, 0, 1, 1], [], []>} : vector<8x32xf32>, vector<32x64xf32>, vector<8x64xf32> -> vector<8x64xf32>
    %c0_3 = arith.constant 0 : index
    %c0_4 = arith.constant 0 : index
    %3 = vector.load %arg5[%c0_3, %c0_4] : memref<1x64xf32, #tpu.memory_space<vmem>>, vector<1x64xf32>
    %4 = vector.broadcast %3 : vector<1x64xf32> to vector<8x64xf32>
    %5 = arith.addf %2, %4 : vector<8x64xf32>
    %c0_5 = arith.constant 0 : index
    %c0_6 = arith.constant 0 : index
    %6 = vector.load %arg6[%c0_5, %c0_6] : memref<8x64xf32, #tpu.memory_space<vmem>>, vector<8x64xf32>
    tpu.vector_store %arg6[%c0_5, %c0_6], %5 {strides = array<i32>} : memref<8x64xf32, #tpu.memory_space<vmem>>, vector<8x64xf32>,
    return
  }
  func.func @transform_0(%arg0: i32, %arg1: i32, %arg2: i32) -> (i32, i32) {
    %c0_i32 = arith.constant 0 : i32
    return %arg0, %arg2 : i32, i32
  }
  func.func @transform_1(%arg0: i32, %arg1: i32, %arg2: i32) -> (i32, i32) {
    %c0_i32 = arith.constant 0 : i32
    return %arg2, %arg1 : i32, i32
  }
  func.func @transform_2(%arg0: i32, %arg1: i32, %arg2: i32) -> (i32, i32) {
    %c0_i32 = arith.constant 0 : i32
    %c0_i32_0 = arith.constant 0 : i32
    return %c0_i32, %arg1 : i32, i32
  }
  func.func @transform_3(%arg0: i32, %arg1: i32, %arg2: i32) -> (i32, i32) {
    %c0_i32 = arith.constant 0 : i32
    return %arg0, %arg1 : i32, i32
  }
}

</mosaic_0001>

<bundles_post_ra>
// kernel: tpu_custom_call.1
= control target key start
LH: loop header
LB: loop body
LE: loop exit
PB: predicated region body
PF: predicated region fallthrough
CT: control target
= control target key end

     0   :  { %8 = vsyncpa [#allocation3], 0  ;;  %s972_s0 = inlined_call_operand.hbm [shape: f32[16,32], index: 0, kind: input, shape index: {}]   ;;  %s973_s1 = inlined_call_operand.hbm [shape: f32[32,64], index: 1, kind: input, shape index: {}]   ;;  %s974_s2 = inlined_call_operand.vmem [shape: f32[1,64], index: 2, kind: input, shape index: {}]   ;;  %s975_s3 = inlined_call_operand.hbm [shape: f32[16,64], index: 3, kind: output, shape index: {}]  }
   0x1   :  { %10 = vsyncpa [#allocation3 + $0x1], 0 }
   0x2   :  { %11 = vsyncpa [#allocation6], 0 }
   0x3   :  { %12 = vsyncpa [#allocation4], 0 }
   0x4   :  { %14 = vsyncpa [#allocation4 + $0x1], 0  ;;  %s755_s12 = smov 0   ;;  %s757_s13 = smov 0  }
   0x5   :  { %s759_s14 = smov 0   ;;  %s761_s15 = smov 0  }
   0x6   :  { %s763_s16 = smov 0   ;;  %s765_s17 = smov 0  }
   0x7 LB: > { %s463_s18 = sadd.s32 4294967295, %s725_s17   ;;  %s464_s19 = sadd.s32 4294967294, %s725_s17   ;;  %s725_s17 = sphi %s765_s17, %s20_s17   ;;  %s721_s16 = sphi %s763_s16, %s999_s16   ;;  %s717_s15 = sphi %s761_s15, %s998_s15   ;;  %s713_s14 = sphi %s759_s14, %s997_s14   ;;  %s709_s13 = sphi %s757_s13, %s996_s13   ;;  %s705_s12 = sphi %s755_s12, %s995_s12  }
   0x8   : > { %p61_p0 = scmp.ne.s32.totalorder %s709_s13, %s705_s12  ;;  %p789_p1 = scmp.eq.s32.totalorder %s463_s18, 0 }
   0x9   : > { %p793_p2 = scmp.eq.s32.totalorder %s463_s18, 1  ;;  %p147_p3 = scmp.eq.s32.totalorder %s464_s19, 1 }
   0xa   : > { %s980_s20 = scalar_select %p789_p1, 1, 0 }
   0xb   : > { %s981_s21 = scalar_select %p793_p2, 1, 0 }
   0xc   : > { %p799_p4 = por %p789_p1, %p61_p0  ;;  %p465_p5 = scmp.ge.s32.totalorder %s725_s17, 1 }
   0xd   : > { %p804_p6 = por %p147_p3, %p61_p0  ;;  %p154_p7 = scmp.lt.s32.totalorder %s725_s17, 3 }
   0xe   : > { %s982_s22 = scalar_select %p799_p4, 1, 0 }
   0xf   : > { %s983_s23 = scalar_select %p804_p6, 1, 0 }
  0x10   : > { %p809_p8 = pnand %p465_p5, %p154_p7  ;;  %s727_s25 = smov [#allocation5]  }
  0x11   : > { %s170_s26 = sshll.u32 %s727_s25, 4  ;;  %s39_s28 = sadd.s32 1, %s721_s16  ;;  %s171_s26 = int_to_ptr.vmem [resolvable:$true] %s170_s26 }
  0x12   : > { %s984_s24 = scalar_select %p809_p8, 1, 0 }
  0x13   : > { %p511_p9 = pneg %p809_p8  ;;  %s581_s4 = scalar_lea.hbm %s973_s1, 512 }
  0x14   : > { %p582_p12 = scmp.ne.s32.totalorder %s973_s1, %s581_s4  ;;  %p588_p5 = scmp.lt.u32.totalorder %s581_s4, %s973_s1 }
  0x15   : > { %p818_p11 = pnand %p511_p9, %p789_p1 }
  0x17   : > { %p583_p13 = pneg %p818_p11 }
  0x19   : > { %p584_p0 = pnand %p583_p13, %p582_p12 }
  0x1b   : > { %p585_p3 = pneg %p584_p0 }
  0x1d   : > { %p590_p7 = pnand %p588_p5, %p585_p3 }
  0x1f   : > { %593 = shalt.err (!%p590_p7)
}
  0x20   : > { %s594_s9 = scalar_lea.vmem %s171_s26, 512  ;;  %p602_p1 = scmp.lt.s32.totalorder %s171_s26, %s171_s26 }
  0x21   : > { %p595_p9 = scmp.ne.s32.totalorder %s171_s26, %s594_s9  ;;  %p603_p4 = scmp.lt.s32.totalorder %s594_s9, %s594_s9 }
  0x23   : > { %p597_p10 = pnand %p595_p9, %p583_p13  ;;  %p604_p8 = por %p603_p4, %p602_p1 }
  0x25   : > { %p598_p6 = pneg %p597_p10 }
  0x27   : > { %p605_p2 = pnand %p604_p8, %p598_p6 }
  0x29   : > { %608 = shalt.err (!%p605_p2)
}
  0x2a   : > { %s728_s10 = smov 128   ;;  %s729_s11 = smov 8  }
  0x2b   : > { %514 = dma.hbm_to_vmem [thread:$0]  (!%p818_p11), %s973_s1, 512, %s171_s26, [#allocation6], %s728_s10, %s728_s10, %s729_s11  }
  0x2c   : > { %p41_p1 = scmp.ge.s32.totalorder %s39_s28, 2  ;;  %s48_s25 = sadd.s32 1, %s713_s14 }
  0x2d   : > { %p55_p2 = scmp.ne.s32.totalorder %s713_s14, %s709_s13  ;;  %p56_p4 = scmp.eq.s32.totalorder %s725_s17, 0 }
  0x2e   : > { %s1001_s28 = smov (%p41_p1, %s39_s28), 0  ;;  %p987_p8 = scmp.ne.s32.totalorder %s981_s21, 0 }
  0x2f   : > { %p845_p6 = por %p56_p4, %p55_p2  ;;  %s43_s27 = ssub.s32 %s721_s16, %s1001_s28 }
  0x30   : > { %p851_p10 = por %p987_p8, %p55_p2  ;;  %p524_p12 = scmp.lt.s32.totalorder %s725_s17, 2 }
  0x31   : > { %p46_p11 = scmp.eq.s32.totalorder %s43_s27, 0  ;;  %s190_s26 = sand.u32 1, %s713_s14  }
  0x32   : > { %s469_s4 = sshll.u32 %s190_s26, 3  ;;  %s470_s6 = sshll.u32 %s721_s16, 7 }
  0x33   : > { %s860_s5 = scalar_select %p46_p11, %s713_s14, %s48_s25  }
  0x34   : > { %s866_s9 = scalar_lea.hbm %s972_s0, %s470_s6  ;;  %s194_s21 = scalar_lea.vmem [#allocation2], %s469_s4 }
  0x35   : > { %s202_s10 = sshll.u32 %s194_s21, 4  ;;  %p872_p13 = pnand %p524_p12, %p845_p6  ;;  %s868_s10 = int_to_ptr.vmem [resolvable:$true] %s202_s10 }
  0x36   : > { %s191_s18 = scalar_lea.sflag [#allocation3], %s190_s26  ;;  %s609_s19 = scalar_lea.hbm %s866_s9, 128 }
  0x37   : > { %p610_p0 = scmp.ne.s32.totalorder %s866_s9, %s609_s19  ;;  %p611_p3 = pneg %p872_p13 }
  0x38   : > { %s614_s4 = scalar_lea.hbm %s972_s0, 256  ;;  %p615_p9 = scmp.lt.u32.totalorder %s866_s9, %s972_s0 }
  0x39   : > { %p612_p5 = pnand %p611_p3, %p610_p0  ;;  %p616_p1 = scmp.lt.u32.totalorder %s614_s4, %s609_s19 }
  0x3a   : > { %p618_p4 = scmp.lt.u32.totalorder %s609_s19, %s866_s9 }
  0x3b   : > { %p613_p7 = pneg %p612_p5  ;;  %p617_p2 = por %p616_p1, %p615_p9 }
  0x3d   : > { %p619_p6 = por %p618_p4, %p617_p2 }
  0x3f   : > { %p620_p8 = pnand %p619_p6, %p613_p7 }
  0x41   : > { %623 = shalt.err (!%p620_p8)
}
  0x42   : > { %s624_s26 = scalar_lea.vmem %s868_s10, 128  ;;  %s730_s7 = smov [#allocation2]  }
  0x43   : > { %p625_p12 = scmp.ne.s32.totalorder %s868_s10, %s624_s26  ;;  %s629_s8 = sshll.u32 %s730_s7, 4  ;;  %s630_s8 = int_to_ptr.vmem [resolvable:$false] %s629_s8 }
  0x44   : > { %s631_s21 = scalar_lea.vmem %s630_s8, 256  ;;  %p632_p5 = scmp.lt.s32.totalorder %s868_s10, %s630_s8 }
  0x45   : > { %p627_p11 = pnand %p625_p12, %p611_p3  ;;  %p633_p9 = scmp.lt.s32.totalorder %s631_s21, %s624_s26 }
  0x47   : > { %p628_p0 = pneg %p627_p11  ;;  %p634_p1 = por %p633_p9, %p632_p5 }
  0x49   : > { %p635_p2 = pnand %p634_p1, %p628_p0 }
  0x4b   : > { %638 = shalt.err (!%p635_p2)
}
  0x4c   : > { %518 = dma.hbm_to_vmem [thread:$0]  (!%p872_p13), %s866_s9, 128, %s868_s10, %s191_s18  }
  0x4d   : > { %p990_p7 = scmp.ne.s32.totalorder %s984_s24, 0 }
  0x4e   : > { %s904_s19 = sand.u32 (!%p990_p7), 1, %s709_s13   ;;  %p991_p3 = scmp.ne.s32.totalorder (!%p990_p7), %s982_s22, 0 }
  0x4f   : > { %211 = sbr.rel (%p990_p7) target bundleno = 329 (0x149), region = 32  ;;  %s472_s25 = sshll.u32 (!%p990_p7), %s904_s19, 3 }
  0x50   : > { %s214_s27 = scalar_lea.sflag (!%p990_p7), [#allocation3], %s904_s19  ;;  %s217_s4 = scalar_lea.vmem (!%p990_p7), [#allocation2], %s472_s25 }
  0x56   : > { %692 = dma.done.wait (%p991_p3), %s214_s27, 128  }
  0x57   : > { %694 = vsyncadd (%p991_p3), %s214_s27, 4294967168  ;;  %p992_p4 = scmp.ne.s32.totalorder %s980_s20, 0 }
  0x59   : > { %696 = dma.done.wait (%p992_p4), [#allocation6], 512  }
  0x5a   : > { %698 = vsyncadd (%p992_p4), [#allocation6], 4294966784  ;;  %v731_v0 = vmov 0.0|0.0   ;;  %vm732_vm0 = vmmov 0   ;;  %v733_v1 = vmov 0.0   ;;  %v252_v2 = vld [vmem:[#allocation5] sm:$0xff] }
  0x5b   : > { %497 = vmatprep.subr.bf16.mxu0 %v731_v0  ;;  %494 = vmatprep.mubr.msk.f32.mxu0 %vm732_vm0, %v733_v1  ;;  %v253_v3 = vld [vmem:[#allocation5 + $0x8] sm:$0xff]  ;;  %v254_v4 = vld [vmem:[#allocation5 + $0x10] sm:$0xff]  ;;  %v255_v6 = vld [vmem:[#allocation5 + $0x18] sm:$0xff]  ;;  %vm263_vm1 = vcmask 261120   ;;  %s478_s24 = sshll.u32 %s717_s15, 7  ;;  %s246_s9 = scalar_lea.vmem [#allocation7], %s472_s25 }
  0x5c   : > { %v498_v5 = vpack.c.bf16 %v253_v3, %v252_v2  ;;  %v501_v7 = vpack.c.bf16 %v255_v6, %v254_v4  ;;  %v251_v8 = vld [vmem:[%s217_s4] sm:$0xff]  ;;  %s354_s10 = sshll.u32 %s246_s9, 4  ;;  %vm337_vm2 = vcmask 523264   ;;  %s923_s29 = scalar_lea.hbm %s975_s3, %s478_s24  ;;  %s925_s10 = int_to_ptr.vmem [resolvable:$true] %s354_s10 }
  0x5d   : > { %v475_v9 = vld [vmem:[%s974_s2] ss:$0 sm:$0xff]  ;;  %s340_s6 = scalar_lea.sflag [#allocation4], %s904_s19  ;;  %s639_s26 = scalar_lea.vmem %s925_s10, 128 }
  0x5e   : > { %499 = vmatpush3.bf16.msra.mxu0 %v498_v5  ;;  %p640_p13 = scmp.ne.s32.totalorder %s925_s10, %s639_s26  ;;  %s734_s15 = smov [#allocation7]  }
  0x5f   : > { %500 = vmatprep.subr.bf16.mxu0 %v731_v0  ;;  %s643_s7 = sshll.u32 %s734_s15, 4  ;;  %s644_s7 = int_to_ptr.vmem [resolvable:$false] %s643_s7 }
  0x60   : > { %p641_p6 = pnand %p640_p13, %p851_p10  ;;  %s645_s8 = scalar_lea.vmem %s644_s7, 256 }
  0x61   : > { %p646_p12 = scmp.lt.s32.totalorder %s925_s10, %s644_s7  ;;  %p647_p11 = scmp.lt.s32.totalorder %s645_s8, %s639_s26 }
  0x62   : > { %502 = vmatpush3.bf16.msra.mxu0 %v501_v7  ;;  %p642_p8 = pneg %p641_p6 }
  0x63   : > { %p648_p0 = por %p647_p11, %p646_p12 }
  0x65   : > { %495 = vmatmul.mubr.msk.f32.vlgmr.msra.gmra.mrb[0].mxu0 %vm263_vm1, %v251_v8  ;;  %p649_p5 = pnand %p648_p0, %p642_p8 }
 0x138   : > { %v333_v10 = vpop.f32.mrb[0].mxu0 }
 0x139   : > { %v334_v11 = vadd.f32 %v475_v9, %v333_v10  ;;  %v496_v12 = vpop.f32.mrb[1].mxu0 }
 0x13b   : > { %338 = vst.msk [vmem:[%s246_s9] sm:$0xff] %vm337_vm2, %v334_v11 }
 0x13c   : > { %652 = shalt.err (!%p649_p5)
}
 0x13d   : > { %s653_s21 = scalar_lea.hbm %s923_s29, 128  ;;  %s657_s27 = scalar_lea.hbm %s975_s3, 256 }
 0x13e   : > { %p654_p9 = scmp.ne.s32.totalorder %s923_s29, %s653_s21  ;;  %p658_p7 = scmp.lt.u32.totalorder %s923_s29, %s975_s3 }
 0x13f   : > { %p659_p3 = scmp.lt.u32.totalorder %s657_s27, %s653_s21  ;;  %p661_p13 = scmp.lt.u32.totalorder %s653_s21, %s923_s29 }
 0x140   : > { %p655_p1 = pnand %p654_p9, %p851_p10 }
 0x141   : > { %p660_p4 = por %p659_p3, %p658_p7 }
 0x142   : > { %p656_p2 = pneg %p655_p1 }
 0x143   : > { %p662_p6 = por %p661_p13, %p660_p4 }
 0x145   : > { %p663_p8 = pnand %p662_p6, %p656_p2 }
 0x147   : > { %666 = shalt.err (!%p663_p8)
}
 0x148   : > { %509 = dma.vmem_to_hbm [thread:$0]  (%p851_p10), %s925_s10, 128, %s923_s29, %s340_s6  }
 0x149 PF: > { %s366_s22 = sand.u32 1, %s705_s12   ;;  %p993_p12 = scmp.ne.s32.totalorder %s983_s23, 0 }
 0x14a   : > { %p994_p11 = scmp.ge.s32.totalorder %s725_s17, 2  ;;  %s367_s24 = scalar_lea.sflag [#allocation4], %s366_s22 }
 0x14c   : > { %p520_p0 = pnand %p994_p11, %p993_p12 }
 0x14e   : > { %700 = dma.done.wait (!%p520_p0), %s367_s24, 128  }
 0x14f   : > { %702 = vsyncadd (!%p520_p0), %s367_s24, 4294967168  ;;  %s20_s17 = sadd.s32 1, %s725_s17   ;;  %s995_s12 = smov %s709_s13 }
 0x150   : > { %p17_p5 = scmp.ge.s32.totalorder %s20_s17, 4   ;;  %s996_s13 = smov %s713_s14 }
 0x151   : > { %s997_s14 = smov %s860_s5  ;;  %s998_s15 = smov %s721_s16 }
 0x152   : > { %s999_s16 = smov %s1001_s28  ;;  %19 = sbr.rel (!%p17_p5) target bundleno = 7 (0x7), region = 85 }
 0x159   :  { %372 = vsyncpa [#allocation3], 1 }
 0x15a   :  { %374 = vsyncpa [#allocation3 + $0x1], 1 }
 0x15b   :  { %375 = vsyncpa [#allocation6], 1 }
 0x15c   :  { %376 = vsyncpa [#allocation4], 1 }
 0x15d   :  { %378 = vsyncpa [#allocation4 + $0x1], 1 }

</bundles_post_ra>
